<compile_context>
chip_gen: v6e
topology: v6e:2x2x1
jax: 0.10.0
libtpu: 0.0.40
codegen_flags: <defaults>
</compile_context>

<pallas_src>
import functools

import jax
import jax.numpy as jnp
from jax import lax
from jax.experimental import pallas as pl
from jax.experimental.pallas import tpu as pltpu


def _se_basic_block_kernel(
    x_ref,       # (NB, H, W*C)     input block, lane-dense layout
    w1_ref,      # (3*W*C, W*C)     block-Toeplitz conv1 weight (W-halo folded in)
    w2_ref,      # (3*W*C, W*C)     block-Toeplitz conv2 weight (bn2 scale folded)
    bn1s_ref,    # (1, W*C)         bn1 scale, W-tiled
    bn1b_ref,    # (1, W*C)         bn1 shift, W-tiled
    bn2b_ref,    # (1, W*C)         bn2 shift, W-tiled
    fc1w_ref,    # (W*C, Cr)        fc1 weight with avg-pool (1/(H*W)) folded
    fc1b_ref,    # (1, Cr)
    fc2w_ref,    # (Cr, W*C)        fc2 weight, W-tiled on output
    fc2b_ref,    # (1, W*C)
    o_ref,       # (NB, H, W*C)
    *, H):
    NB = x_ref.shape[0]
    WC = x_ref.shape[2]
    M = NB * H
    f32 = jnp.float32

    x3 = x_ref[...].astype(f32)                     # (NB, H, WC)
    x = x3.reshape(M, WC)                           # rows = batch-major, H minor

    # Masks that re-create per-image "SAME" padding in H when several batch
    # items share the M (row) dimension.
    row = lax.broadcasted_iota(jnp.int32, (M, WC), 0)
    h_loc = row % H
    top_mask = h_loc == 0                           # rows whose h-1 neighbour is pad
    bot_mask = h_loc == (H - 1)                     # rows whose h+1 neighbour is pad

    def conv(a, w_ref):
        # Build the 3 H-shifted bands (lane-aligned concats only; the W-halo is
        # already folded into the weight so K = 3*WC exactly).
        zrow = jnp.zeros((1, WC), f32)
        up = jnp.concatenate([zrow, a[:M - 1]], axis=0)     # up[r]   = a[r-1]
        dn = jnp.concatenate([a[1:], zrow], axis=0)         # dn[r]   = a[r+1]
        up = jnp.where(top_mask, 0.0, up)
        dn = jnp.where(bot_mask, 0.0, dn)
        lhs = jnp.concatenate([up, a, dn], axis=1)          # (M, 3*WC)
        return jnp.dot(lhs.astype(w_ref.dtype), w_ref[...],
                       preferred_element_type=f32)          # (M, WC)

    # ---- conv1 -> relu -> bn1 affine
    z = conv(x, w1_ref)
    z = jnp.maximum(z, 0.0) * bn1s_ref[...] + bn1b_ref[...]

    # ---- conv2 (bn2 scale pre-folded into columns) + bn2 shift
    out = conv(z, w2_ref) + bn2b_ref[...]                   # (M, WC)

    # ---- SE: per-image pool (sum over H here; /(H*W) + W-sum folded in fc1w)
    ysum = jnp.sum(out.reshape(NB, H, WC), axis=1)          # (NB, WC)
    h = jnp.dot(ysum, fc1w_ref[...], preferred_element_type=f32) + fc1b_ref[...]
    h = jnp.maximum(h, 0.0)                                  # (NB, Cr)
    s = jax.nn.sigmoid(
        jnp.dot(h, fc2w_ref[...], preferred_element_type=f32)
        + fc2b_ref[...])                                     # (NB, WC)

    # ---- SE scale, residual add, final relu (all lane-dense)
    out3 = out.reshape(NB, H, WC)
    o_ref[...] = jnp.maximum(out3 * s[:, None, :] + x3, 0.0).astype(o_ref.dtype)


def _fold_conv_weight(w, W):
    """HWIO (3,3,Cin,Cout) -> block-Toeplitz (3*W*Cin, W*Cout) so a 3x3 'SAME'
    conv in the (rows, W*Cin) lane-dense layout is a single matmul per H-band.
    The W-boundary taps are zero entries (no halo needed on the LHS)."""
    KH, KW, Cin, Cout = w.shape
    bands = []
    for dh in range(KH):
        blk = jnp.zeros((W * Cin, W * Cout), w.dtype)
        for dw in range(KW):
            # out column wo reads input column wi = wo + dw - 1  =>  wo = wi + 1 - dw
            sel = jnp.eye(W, W, k=1 - dw, dtype=w.dtype)
            blk = blk + jnp.kron(sel, w[dh, dw])
        bands.append(blk)
    return jnp.concatenate(bands, axis=0)                    # (3*W*Cin, W*Cout)


def se_basic_block(x_nhwc, params, use_bf16=False):
    """x_nhwc: (N, H, W, C) float32. params: dict from make_params."""
    N, H, W, C = x_nhwc.shape
    Cr = params["fc1_b"].shape[-1]
    WC = W * C
    K = 3 * WC

    # Lane-dense view: fold W into the minor (lane) axis. Pure reshape, no pad.
    x2d = x_nhwc.reshape(N, H, WC)

    # Wrapper-side constant folding (free): block-Toeplitz conv weights,
    # bn2 scale folded into conv2 columns, SE pooling folded into fc weights.
    w1_big = _fold_conv_weight(params["w1"], W)                            # (K, WC)
    w2_big = (_fold_conv_weight(params["w2"], W)
              * jnp.tile(params["bn2_scale"], W)[None, :])                 # (K, WC)
    bn1s = jnp.tile(params["bn1_scale"], W).reshape(1, WC)
    bn1b = jnp.tile(params["bn1_shift"], W).reshape(1, WC)
    bn2b = jnp.tile(params["bn2_shift"], W).reshape(1, WC)
    fc1w = jnp.tile(params["fc1_w_t"], (W, 1)) / float(H * W)              # (WC, Cr)
    fc1b = params["fc1_b"].reshape(1, Cr)
    fc2w = jnp.tile(params["fc2_w_t"], (1, W))                             # (Cr, WC)
    fc2b = jnp.tile(params["fc2_b"], W).reshape(1, WC)

    if use_bf16:  # v6e/v7x: feed the MXU bf16 conv operands, accumulate in f32
        w1_big = w1_big.astype(jnp.bfloat16)
        w2_big = w2_big.astype(jnp.bfloat16)

    # Pack several batch items into the matmul M dimension (<=256 rows/step).
    nb = 1
    cap = max(1, 256 // H)
    for cand in range(min(N, cap), 0, -1):
        if N % cand == 0:
            nb = cand
            break

    kernel = functools.partial(_se_basic_block_kernel, H=H)
    full2d = lambda shape: pl.BlockSpec(shape, lambda g: (0, 0))

    grid_spec = pltpu.PrefetchScalarGridSpec(
        num_scalar_prefetch=0,
        grid=(N // nb,),
        in_specs=[
            pl.BlockSpec((nb, H, WC), lambda g: (g, 0, 0)),  # x
            full2d((K, WC)),                                 # w1 (block-Toeplitz)
            full2d((K, WC)),                                 # w2 (block-Toeplitz)
            full2d((1, WC)),                                 # bn1 scale
            full2d((1, WC)),                                 # bn1 shift
            full2d((1, WC)),                                 # bn2 shift
            full2d((WC, Cr)),                                # fc1 weight (pool folded)
            full2d((1, Cr)),                                 # fc1 bias
            full2d((Cr, WC)),                                # fc2 weight
            full2d((1, WC)),                                 # fc2 bias
        ],
        out_specs=pl.BlockSpec((nb, H, WC), lambda g: (g, 0, 0)),
    )

    out = pl.pallas_call(
        kernel,
        out_shape=jax.ShapeDtypeStruct((N, H, WC), jnp.float32),
        grid_spec=grid_spec,
        compiler_params=pltpu.CompilerParams(
            dimension_semantics=("parallel",),
            vmem_limit_bytes=32 * 1024 * 1024),
    )(x2d, w1_big, w2_big, bn1s, bn1b, bn2b, fc1w, fc1b, fc2w, fc2b)

    return out.reshape(N, H, W, C)


def make_params(key, inplanes, planes, reduction=8):
    assert inplanes == planes, "downsample=None path requires inplanes == planes"
    C, Cr = planes, max(planes // reduction, 1)
    ks = jax.random.split(key, 12)
    eps = 1e-5

    w1 = 0.1 * jax.random.normal(ks[0], (3, 3, inplanes, C), jnp.float32)
    w2 = 0.1 * jax.random.normal(ks[1], (3, 3, C, C), jnp.float32)

    def bn(kg, kb, km, kv):
        gamma = 1.0 + 0.1 * jax.random.normal(kg, (C,), jnp.float32)
        beta = 0.1 * jax.random.normal(kb, (C,), jnp.float32)
        mean = 0.1 * jax.random.normal(km, (C,), jnp.float32)
        var = jnp.abs(jax.random.normal(kv, (C,), jnp.float32)) + 0.5
        scale = gamma / jnp.sqrt(var + eps)
        shift = beta - mean * scale
        return scale, shift

    bn1_scale, bn1_shift = bn(ks[2], ks[3], ks[4], ks[5])
    bn2_scale, bn2_shift = bn(ks[6], ks[7], ks[8], ks[9])

    fc1_w = 0.3 * jax.random.normal(ks[10], (Cr, C), jnp.float32)   # (out, in)
    fc1_b = 0.1 * jnp.ones((Cr,), jnp.float32)
    fc2_w = 0.3 * jax.random.normal(ks[11], (C, Cr), jnp.float32)
    fc2_b = 0.1 * jnp.ones((C,), jnp.float32)

    return dict(
        w1=w1, w2=w2,
        bn1_scale=bn1_scale, bn1_shift=bn1_shift,
        bn2_scale=bn2_scale, bn2_shift=bn2_shift,
        fc1_w_t=fc1_w.T, fc1_b=fc1_b,
        fc2_w_t=fc2_w.T, fc2_b=fc2_b,
    )


def reference_forward(x_nhwc, params):
    """Pure-JAX reference with identical semantics (for verification)."""
    dn = ("NHWC", "HWIO", "NHWC")
    out = lax.conv_general_dilated(x_nhwc, params["w1"], (1, 1), "SAME",
                                   dimension_numbers=dn)
    out = jnp.maximum(out, 0.0)
    out = out * params["bn1_scale"] + params["bn1_shift"]
    out = lax.conv_general_dilated(out, params["w2"], (1, 1), "SAME",
                                   dimension_numbers=dn)
    out = out * params["bn2_scale"] + params["bn2_shift"]
    y = out.mean(axis=(1, 2))                                  # (N, C)
    h = jnp.maximum(y @ params["fc1_w_t"] + params["fc1_b"], 0.0)
    s = jax.nn.sigmoid(h @ params["fc2_w_t"] + params["fc2_b"])
    out = out * s[:, None, None, :]
    return jnp.maximum(out + x_nhwc, 0.0)


if __name__ == "__main__":
    # inplanes = planes = 8, reduction = 8, W*C = 128 (one full lane group)
    N, C, H, W = 2, 8, 16, 16
    key = jax.random.PRNGKey(0)
    kx, kp = jax.random.split(key)

    x_nchw = jax.random.normal(kx, (N, C, H, W), jnp.float32)  # PyTorch layout
    x_nhwc = jnp.transpose(x_nchw, (0, 2, 3, 1))               # kernel layout

    params = make_params(kp, inplanes=C, planes=C, reduction=8)

    # f32 path (v5e-friendly) — tight check against the pure-JAX reference.
    out = jax.block_until_ready(se_basic_block(x_nhwc, params))
    ref = reference_forward(x_nhwc, params)
    assert out.shape == (N, H, W, C)
    assert jnp.allclose(out, ref, atol=1e-3, rtol=1e-3), (
        float(jnp.max(jnp.abs(out - ref))))

    # bf16 conv-weight path (v6e/v7x MXU) — loose check.
    out_bf16 = jax.block_until_ready(se_basic_block(x_nhwc, params, use_bf16=True))
    assert jnp.allclose(out_bf16, ref, atol=1e-1, rtol=1e-1), (
        float(jnp.max(jnp.abs(out_bf16 - ref))))

    print("KERNEL_OK")
</pallas_src>

<mosaic_0001>
module attributes {stable_mosaic.version = 11 : i64} {
  func.func @_se_basic_block_kernel(%arg0: i32, %arg1: memref<2x16x128xf32, #tpu.memory_space<vmem>>, %arg2: memref<384x128xf32, #tpu.memory_space<vmem>>, %arg3: memref<384x128xf32, #tpu.memory_space<vmem>>, %arg4: memref<1x128xf32, #tpu.memory_space<vmem>>, %arg5: memref<1x128xf32, #tpu.memory_space<vmem>>, %arg6: memref<1x128xf32, #tpu.memory_space<vmem>>, %arg7: memref<128x1xf32, #tpu.memory_space<vmem>>, %arg8: memref<1x1xf32, #tpu.memory_space<vmem>>, %arg9: memref<1x128xf32, #tpu.memory_space<vmem>>, %arg10: memref<1x128xf32, #tpu.memory_space<vmem>>, %arg11: memref<2x16x128xf32, #tpu.memory_space<vmem>>) attributes {dimension_semantics = [#tpu.dimension_semantics<parallel>], iteration_bounds = array<i64: 1>, scalar_prefetch = 0 : i64, scratch_operands = 0 : i64, tpu.core_type = #tpu.core_type<tc>, window_params = [{transform_indices = @transform_0, window_bounds = array<i64: 2, 16, 128>}, {pipeline_mode = #tpu.pipeline_mode<synchronous>, transform_indices = @transform_1, window_bounds = array<i64: 384, 128>}, {pipeline_mode = #tpu.pipeline_mode<synchronous>, transform_indices = @transform_2, window_bounds = array<i64: 384, 128>}, {pipeline_mode = #tpu.pipeline_mode<synchronous>, transform_indices = @transform_3, window_bounds = array<i64: 1, 128>}, {pipeline_mode = #tpu.pipeline_mode<synchronous>, transform_indices = @transform_4, window_bounds = array<i64: 1, 128>}, {pipeline_mode = #tpu.pipeline_mode<synchronous>, transform_indices = @transform_5, window_bounds = array<i64: 1, 128>}, {pipeline_mode = #tpu.pipeline_mode<synchronous>, transform_indices = @transform_6, window_bounds = array<i64: 128, 1>}, {pipeline_mode = #tpu.pipeline_mode<synchronous>, transform_indices = @transform_7, window_bounds = array<i64: 1, 1>}, {pipeline_mode = #tpu.pipeline_mode<synchronous>, transform_indices = @transform_8, window_bounds = array<i64: 1, 128>}, {pipeline_mode = #tpu.pipeline_mode<synchronous>, transform_indices = @transform_9, window_bounds = array<i64: 1, 128>}, {transform_indices = @transform_10, window_bounds = array<i64: 2, 16, 128>}]} {
    %c0 = arith.constant 0 : index
    %c0_0 = arith.constant 0 : index
    %c0_1 = arith.constant 0 : index
    %0 = vector.load %arg1[%c0, %c0_0, %c0_1] : memref<2x16x128xf32, #tpu.memory_space<vmem>>, vector<2x16x128xf32>
    %1 = vector.shape_cast %0 : vector<2x16x128xf32> to vector<32x128xf32>
    %2 = tpu.iota {dimensions = array<i32: 0>} : vector<32x128xi32>
    %c16_i32 = arith.constant 16 : i32
    %c0_i32 = arith.constant 0 : i32
    %3 = arith.cmpi eq, %c16_i32, %c0_i32 : i32
    %c1_i32 = arith.constant 1 : i32
    %4 = arith.select %3, %c1_i32, %c16_i32 : i32
    %5 = vector.broadcast %4 : i32 to vector<32x128xi32>
    %6 = arith.remsi %2, %5 : vector<32x128xi32>
    %c0_i32_2 = arith.constant 0 : i32
    %7 = vector.broadcast %c0_i32_2 : i32 to vector<32x128xi32>
    %8 = arith.cmpi ne, %6, %7 : vector<32x128xi32>
    %c0_i32_3 = arith.constant 0 : i32
    %9 = vector.broadcast %c0_i32_3 : i32 to vector<32x128xi32>
    %10 = arith.cmpi slt, %6, %9 : vector<32x128xi32>
    %c0_i32_4 = arith.constant 0 : i32
    %11 = arith.cmpi slt, %4, %c0_i32_4 : i32
    %12 = vector.broadcast %11 : i1 to vector<32x128xi1>
    %13 = vector.broadcast %12 : vector<32x128xi1> to vector<32x128xi1>
    %14 = arith.xori %10, %13 : vector<32x128xi1>
    %15 = arith.andi %14, %8 : vector<32x128xi1>
    %16 = vector.broadcast %4 : i32 to vector<32x128xi32>
    %17 = arith.addi %6, %16 : vector<32x128xi32>
    %18 = arith.select %15, %17, %6 : vector<32x128xi1>, vector<32x128xi32>
    %c0_i32_5 = arith.constant 0 : i32
    %19 = vector.broadcast %c0_i32_5 : i32 to vector<32x128xi32>
    %20 = arith.cmpi eq, %18, %19 : vector<32x128xi32>
    %c15_i32 = arith.constant 15 : i32
    %21 = vector.broadcast %c15_i32 : i32 to vector<32x128xi32>
    %22 = arith.cmpi eq, %18, %21 : vector<32x128xi32>
    %cst = arith.constant 0.000000e+00 : f32
    %23 = vector.broadcast %cst : f32 to vector<1x128xf32>
    %24 = vector.extract_strided_slice %1 {offsets = [0, 0], sizes = [31, 128], strides = [1, 1]} : vector<32x128xf32> to vector<31x128xf32>
    %25 = tpu.concatenate %23, %24 in 0 : vector<1x128xf32>, vector<31x128xf32> -> vector<32x128xf32>
    %26 = vector.extract_strided_slice %1 {offsets = [1, 0], sizes = [31, 128], strides = [1, 1]} : vector<32x128xf32> to vector<31x128xf32>
    %27 = tpu.concatenate %26, %23 in 0 : vector<31x128xf32>, vector<1x128xf32> -> vector<32x128xf32>
    %cst_6 = arith.constant 0.000000e+00 : f32
    %28 = vector.broadcast %cst_6 : f32 to vector<32x128xf32>
    %29 = arith.select %20, %28, %25 : vector<32x128xi1>, vector<32x128xf32>
    %cst_7 = arith.constant 0.000000e+00 : f32
    %30 = vector.broadcast %cst_7 : f32 to vector<32x128xf32>
    %31 = arith.select %22, %30, %27 : vector<32x128xi1>, vector<32x128xf32>
    %32 = tpu.concatenate %29, %1, %31 in 1 : vector<32x128xf32>, vector<32x128xf32>, vector<32x128xf32> -> vector<32x384xf32>
    %c0_8 = arith.constant 0 : index
    %c0_9 = arith.constant 0 : index
    %33 = vector.load %arg2[%c0_8, %c0_9] : memref<384x128xf32, #tpu.memory_space<vmem>>, vector<384x128xf32>
    %cst_10 = arith.constant dense<0.000000e+00> : vector<32x128xf32>
    %34 = tpu.matmul %32, %33, %cst_10 {dimension_numbers = #tpu.dot_dimension_numbers<[1], [0], [0], [1], [0, 0, 1, 1], [], []>} : vector<32x384xf32>, vector<384x128xf32>, vector<32x128xf32> -> vector<32x128xf32>
    %cst_11 = arith.constant 0.000000e+00 : f32
    %35 = vector.broadcast %cst_11 : f32 to vector<32x128xf32>
    %36 = arith.maximumf %34, %35 : vector<32x128xf32>
    %c0_12 = arith.constant 0 : index
    %c0_13 = arith.constant 0 : index
    %37 = vector.load %arg4[%c0_12, %c0_13] : memref<1x128xf32, #tpu.memory_space<vmem>>, vector<1x128xf32>
    %38 = vector.broadcast %37 : vector<1x128xf32> to vector<32x128xf32>
    %39 = arith.mulf %36, %38 : vector<32x128xf32>
    %c0_14 = arith.constant 0 : index
    %c0_15 = arith.constant 0 : index
    %40 = vector.load %arg5[%c0_14, %c0_15] : memref<1x128xf32, #tpu.memory_space<vmem>>, vector<1x128xf32>
    %41 = vector.broadcast %40 : vector<1x128xf32> to vector<32x128xf32>
    %42 = arith.addf %39, %41 : vector<32x128xf32>
    %cst_16 = arith.constant 0.000000e+00 : f32
    %43 = vector.broadcast %cst_16 : f32 to vector<1x128xf32>
    %44 = vector.extract_strided_slice %42 {offsets = [0, 0], sizes = [31, 128], strides = [1, 1]} : vector<32x128xf32> to vector<31x128xf32>
    %45 = tpu.concatenate %43, %44 in 0 : vector<1x128xf32>, vector<31x128xf32> -> vector<32x128xf32>
    %46 = vector.extract_strided_slice %42 {offsets = [1, 0], sizes = [31, 128], strides = [1, 1]} : vector<32x128xf32> to vector<31x128xf32>
    %47 = tpu.concatenate %46, %43 in 0 : vector<31x128xf32>, vector<1x128xf32> -> vector<32x128xf32>
    %cst_17 = arith.constant 0.000000e+00 : f32
    %48 = vector.broadcast %cst_17 : f32 to vector<32x128xf32>
    %49 = arith.select %20, %48, %45 : vector<32x128xi1>, vector<32x128xf32>
    %cst_18 = arith.constant 0.000000e+00 : f32
    %50 = vector.broadcast %cst_18 : f32 to vector<32x128xf32>
    %51 = arith.select %22, %50, %47 : vector<32x128xi1>, vector<32x128xf32>
    %52 = tpu.concatenate %49, %42, %51 in 1 : vector<32x128xf32>, vector<32x128xf32>, vector<32x128xf32> -> vector<32x384xf32>
    %c0_19 = arith.constant 0 : index
    %c0_20 = arith.constant 0 : index
    %53 = vector.load %arg3[%c0_19, %c0_20] : memref<384x128xf32, #tpu.memory_space<vmem>>, vector<384x128xf32>
    %cst_21 = arith.constant dense<0.000000e+00> : vector<32x128xf32>
    %54 = tpu.matmul %52, %53, %cst_21 {dimension_numbers = #tpu.dot_dimension_numbers<[1], [0], [0], [1], [0, 0, 1, 1], [], []>} : vector<32x384xf32>, vector<384x128xf32>, vector<32x128xf32> -> vector<32x128xf32>
    %c0_22 = arith.constant 0 : index
    %c0_23 = arith.constant 0 : index
    %55 = vector.load %arg6[%c0_22, %c0_23] : memref<1x128xf32, #tpu.memory_space<vmem>>, vector<1x128xf32>
    %56 = vector.broadcast %55 : vector<1x128xf32> to vector<32x128xf32>
    %57 = arith.addf %54, %56 : vector<32x128xf32>
    %58 = vector.shape_cast %57 : vector<32x128xf32> to vector<2x16x128xf32>
    %cst_24 = arith.constant dense<0.000000e+00> : vector<2x128xf32>
    %59 = vector.multi_reduction <add>, %58, %cst_24 [1] : vector<2x16x128xf32> to vector<2x128xf32>
    %c0_25 = arith.constant 0 : index
    %c0_26 = arith.constant 0 : index
    %60 = vector.load %arg7[%c0_25, %c0_26] : memref<128x1xf32, #tpu.memory_space<vmem>>, vector<128x1xf32>
    %cst_27 = arith.constant dense<0.000000e+00> : vector<2x1xf32>
    %61 = tpu.matmul %59, %60, %cst_27 {dimension_numbers = #tpu.dot_dimension_numbers<[1], [0], [0], [1], [0, 0, 1, 1], [], []>} : vector<2x128xf32>, vector<128x1xf32>, vector<2x1xf32> -> vector<2x1xf32>
    %c0_28 = arith.constant 0 : index
    %c0_29 = arith.constant 0 : index
    %62 = vector.load %arg8[%c0_28, %c0_29] : memref<1x1xf32, #tpu.memory_space<vmem>>, vector<1x1xf32>
    %63 = vector.broadcast %62 : vector<1x1xf32> to vector<2x1xf32>
    %64 = arith.addf %61, %63 : vector<2x1xf32>
    %cst_30 = arith.constant 0.000000e+00 : f32
    %65 = vector.broadcast %cst_30 : f32 to vector<2x1xf32>
    %66 = arith.maximumf %64, %65 : vector<2x1xf32>
    %c0_31 = arith.constant 0 : index
    %c0_32 = arith.constant 0 : index
    %67 = vector.load %arg9[%c0_31, %c0_32] : memref<1x128xf32, #tpu.memory_space<vmem>>, vector<1x128xf32>
    %cst_33 = arith.constant dense<0.000000e+00> : vector<2x128xf32>
    %68 = tpu.matmul %66, %67, %cst_33 {dimension_numbers = #tpu.dot_dimension_numbers<[1], [0], [0], [1], [0, 0, 1, 1], [], []>} : vector<2x1xf32>, vector<1x128xf32>, vector<2x128xf32> -> vector<2x128xf32>
    %c0_34 = arith.constant 0 : index
    %c0_35 = arith.constant 0 : index
    %69 = vector.load %arg10[%c0_34, %c0_35] : memref<1x128xf32, #tpu.memory_space<vmem>>, vector<1x128xf32>
    %70 = vector.broadcast %69 : vector<1x128xf32> to vector<2x128xf32>
    %71 = arith.addf %68, %70 : vector<2x128xf32>
    %72 = arith.negf %71 : vector<2x128xf32>
    %73 = math.exp %72 : vector<2x128xf32>
    %cst_36 = arith.constant 1.000000e+00 : f32
    %74 = vector.broadcast %cst_36 : f32 to vector<2x128xf32>
    %75 = arith.addf %74, %73 : vector<2x128xf32>
    %76 = arith.divf %74, %75 : vector<2x128xf32>
    %77 = vector.shape_cast %57 : vector<32x128xf32> to vector<2x16x128xf32>
    %78 = vector.shape_cast %76 : vector<2x128xf32> to vector<2x1x128xf32>
    %79 = vector.broadcast %78 : vector<2x1x128xf32> to vector<2x16x128xf32>
    %80 = arith.mulf %77, %79 : vector<2x16x128xf32>
    %81 = arith.addf %80, %0 : vector<2x16x128xf32>
    %cst_37 = arith.constant 0.000000e+00 : f32
    %82 = vector.broadcast %cst_37 : f32 to vector<2x16x128xf32>
    %83 = arith.maximumf %81, %82 : vector<2x16x128xf32>
    %c0_38 = arith.constant 0 : index
    %c0_39 = arith.constant 0 : index
    %c0_40 = arith.constant 0 : index
    %84 = vector.load %arg11[%c0_38, %c0_39, %c0_40] : memref<2x16x128xf32, #tpu.memory_space<vmem>>, vector<2x16x128xf32>
    tpu.vector_store %arg11[%c0_38, %c0_39, %c0_40], %83 {strides = array<i32>} : memref<2x16x128xf32, #tpu.memory_space<vmem>>, vector<2x16x128xf32>,
    return
  }
  func.func @transform_0(%arg0: i32) -> (i32, i32, i32) {
    %c0_i32 = arith.constant 0 : i32
    %c0_i32_0 = arith.constant 0 : i32
    %c0_i32_1 = arith.constant 0 : i32
    return %arg0, %c0_i32, %c0_i32_0 : i32, i32, i32
  }
  func.func @transform_1(%arg0: i32) -> (i32, i32) {
    %c0_i32 = arith.constant 0 : i32
    %c0_i32_0 = arith.constant 0 : i32
    %c0_i32_1 = arith.constant 0 : i32
    return %c0_i32, %c0_i32_0 : i32, i32
  }
  func.func @transform_2(%arg0: i32) -> (i32, i32) {
    %c0_i32 = arith.constant 0 : i32
    %c0_i32_0 = arith.constant 0 : i32
    %c0_i32_1 = arith.constant 0 : i32
    return %c0_i32, %c0_i32_0 : i32, i32
  }
  func.func @transform_3(%arg0: i32) -> (i32, i32) {
    %c0_i32 = arith.constant 0 : i32
    %c0_i32_0 = arith.constant 0 : i32
    %c0_i32_1 = arith.constant 0 : i32
    return %c0_i32, %c0_i32_0 : i32, i32
  }
  func.func @transform_4(%arg0: i32) -> (i32, i32) {
    %c0_i32 = arith.constant 0 : i32
    %c0_i32_0 = arith.constant 0 : i32
    %c0_i32_1 = arith.constant 0 : i32
    return %c0_i32, %c0_i32_0 : i32, i32
  }
  func.func @transform_5(%arg0: i32) -> (i32, i32) {
    %c0_i32 = arith.constant 0 : i32
    %c0_i32_0 = arith.constant 0 : i32
    %c0_i32_1 = arith.constant 0 : i32
    return %c0_i32, %c0_i32_0 : i32, i32
  }
  func.func @transform_6(%arg0: i32) -> (i32, i32) {
    %c0_i32 = arith.constant 0 : i32
    %c0_i32_0 = arith.constant 0 : i32
    %c0_i32_1 = arith.constant 0 : i32
    return %c0_i32, %c0_i32_0 : i32, i32
  }
  func.func @transform_7(%arg0: i32) -> (i32, i32) {
    %c0_i32 = arith.constant 0 : i32
    %c0_i32_0 = arith.constant 0 : i32
    %c0_i32_1 = arith.constant 0 : i32
    return %c0_i32, %c0_i32_0 : i32, i32
  }
  func.func @transform_8(%arg0: i32) -> (i32, i32) {
    %c0_i32 = arith.constant 0 : i32
    %c0_i32_0 = arith.constant 0 : i32
    %c0_i32_1 = arith.constant 0 : i32
    return %c0_i32, %c0_i32_0 : i32, i32
  }
  func.func @transform_9(%arg0: i32) -> (i32, i32) {
    %c0_i32 = arith.constant 0 : i32
    %c0_i32_0 = arith.constant 0 : i32
    %c0_i32_1 = arith.constant 0 : i32
    return %c0_i32, %c0_i32_0 : i32, i32
  }
  func.func @transform_10(%arg0: i32) -> (i32, i32, i32) {
    %c0_i32 = arith.constant 0 : i32
    %c0_i32_0 = arith.constant 0 : i32
    %c0_i32_1 = arith.constant 0 : i32
    return %arg0, %c0_i32, %c0_i32_0 : i32, i32, i32
  }
}

</mosaic_0001>

<bundles_post_ra>
// kernel: tpu_custom_call.1
= control target key start
LH: loop header
LB: loop body
LE: loop exit
PB: predicated region body
PF: predicated region fallthrough
CT: control target
= control target key end

     0   :  { %s1554_s0 = inlined_call_operand.vmem [shape: f32[2,16,128], index: 0, kind: input, shape index: {}]   ;;  %s1555_s1 = inlined_call_operand.hbm [shape: f32[384,128], index: 1, kind: input, shape index: {}]   ;;  %s1556_s2 = inlined_call_operand.hbm [shape: f32[384,128], index: 2, kind: input, shape index: {}]   ;;  %s1557_s3 = inlined_call_operand.vmem [shape: f32[1,128], index: 3, kind: input, shape index: {}]   ;;  %s1558_s4 = inlined_call_operand.vmem [shape: f32[1,128], index: 4, kind: input, shape index: {}]   ;;  %s1559_s5 = inlined_call_operand.vmem [shape: f32[1,128], index: 5, kind: input, shape index: {}]   ;;  %s1560_s6 = inlined_call_operand.vmem [shape: f32[128,1], index: 6, kind: input, shape index: {}]   ;;  %s1561_s7 = inlined_call_operand.<no memory space> [shape: f32[1,1], index: 7, kind: input, shape index: {}]   ;;  %s1562_s8 = inlined_call_operand.vmem [shape: f32[1,128], index: 8, kind: input, shape index: {}]   ;;  %s1563_s9 = inlined_call_operand.vmem [shape: f32[1,128], index: 9, kind: input, shape index: {}]   ;;  %s1564_s10 = inlined_call_operand.hbm [shape: f32[2,16,128], index: 10, kind: output, shape index: {}]  }
   0x1   :  { %v15_v0 = vstv %s1561_s7 }
   0x2   :  { %16 = vst [vmem:[#allocation2] sm:$0x1] %v15_v0 }
   0x3   :  { %17 = vsyncpa [#allocation4], 0 }
   0x4   :  { %18 = vsyncpa [#allocation7], 0 }
   0x5   :  { %19 = vsyncpa [#allocation5], 0  ;;  %s1314_s15 = smov [#allocation3]  }
   0x6   :  { %s27_s16 = sshll.u32 %s1314_s15, 4  ;;  %s28_s16 = int_to_ptr.vmem [resolvable:$true] %s27_s16 }
   0x7   :  { %s1256_s17 = scalar_lea.vmem %s28_s16, 6144  ;;  %p1261_p1 = scmp.lt.s32.totalorder %s28_s16, %s28_s16 }
   0x8   :  { %p1257_p0 = scmp.ne.s32.totalorder %s28_s16, %s1256_s17  ;;  %p1262_p2 = scmp.lt.s32.totalorder %s1256_s17, %s1256_s17 }
   0xa   :  { %p1263_p3 = por %p1262_p2, %p1261_p1 }
   0xc   :  { %p1264_p4 = pnand %p1263_p3, %p1257_p0 }
   0xe   :  { %1267 = shalt.err (!%p1264_p4)
}
   0xf   :  { %s1315_s18 = smov 128   ;;  %s1316_s19 = smov 8  }
  0x10   :  { %33 = dma.hbm_to_vmem [thread:$0]  %s1555_s1, 6144, %s28_s16, [#allocation4], %s1315_s18, %s1315_s18, %s1316_s19  }
  0x11   :  { %s1317_s21 = smov [#allocation6]  }
  0x12   :  { %s39_s22 = sshll.u32 %s1317_s21, 4  ;;  %s40_s22 = int_to_ptr.vmem [resolvable:$true] %s39_s22 }
  0x13   :  { %s1276_s23 = scalar_lea.vmem %s40_s22, 6144  ;;  %p1281_p6 = scmp.lt.s32.totalorder %s40_s22, %s40_s22 }
  0x14   :  { %p1277_p5 = scmp.ne.s32.totalorder %s40_s22, %s1276_s23  ;;  %p1282_p7 = scmp.lt.s32.totalorder %s1276_s23, %s1276_s23 }
  0x16   :  { %p1283_p8 = por %p1282_p7, %p1281_p6 }
  0x18   :  { %p1284_p9 = pnand %p1283_p8, %p1277_p5 }
  0x1a   :  { %1287 = shalt.err (!%p1284_p9)
}
  0x1b   :  { %45 = dma.hbm_to_vmem [thread:$0]  %s1556_s2, 6144, %s40_s22, [#allocation7], %s1315_s18, %s1315_s18, %s1316_s19  }
  0x1c   :  { %1308 = dma.done.wait [#allocation4], 6144  }
  0x1d   :  { %1309 = vsyncadd [#allocation4], 4294961152 }
  0x1e   :  { %1310 = dma.done.wait [#allocation7], 6144  }
  0x1f   :  { %1311 = vsyncadd [#allocation7], 4294961152  ;;  %v200_v1 = vld [vmem:[#allocation3 + $0xf8] sm:$0xff]  ;;  %v199_v4 = vld [vmem:[#allocation3 + $0xf0] sm:$0xff]  ;;  %v70_v28 = vlaneseq  ;;  %vm148_vm0 = vcmask 1046528   ;;  %vm135_vm1 = vcmask 1040384  }
  0x20   :  { %v216_v2 = vld [vmem:[#allocation3 + $0x178] sm:$0xff]  ;;  %973 = vmatprep.subr.mxu0 %v200_v1  ;;  %v215_v5 = vld [vmem:[#allocation3 + $0x170] sm:$0xff]  ;;  %v198_v7 = vld [vmem:[#allocation3 + $0xe8] sm:$0xff]  ;;  %vm1319_vm6 = vmmov 0   ;;  %vm713_vm7 = vcmask 1041409   ;;  %vm795_vm8 = vcmask 7168  }
  0x21   :  { %v184_v3 = vld [vmem:[#allocation3 + $0x78] sm:$0xff]  ;;  %1120 = vmatprep.subr.mxu1 %v216_v2  ;;  %v183_v6 = vld [vmem:[#allocation3 + $0x70] sm:$0xff]  ;;  %v214_v8 = vld [vmem:[#allocation3 + $0x168] sm:$0xff]  ;;  %v1392_v35 = vshrl.u32 %v70_v28, 7 }
  0x22   :  { %974 = vmatpush3.msra.mxu0 %v184_v3  ;;  %1121 = vmatpush3.msra.mxu1 %v216_v2  ;;  %v182_v9 = vld [vmem:[#allocation3 + $0x68] sm:$0xff]  ;;  %v197_v10 = vld [vmem:[#allocation3 + $0xe0] sm:$0xff]  ;;  %v196_v13 = vld [vmem:[#allocation3 + $0xd8] sm:$0xff] }
  0x23   :  { %975 = vmatprep.subr.mxu0 %v199_v4  ;;  %1122 = vmatprep.subr.mxu1 %v215_v5  ;;  %v213_v11 = vld [vmem:[#allocation3 + $0x160] sm:$0xff]  ;;  %v212_v14 = vld [vmem:[#allocation3 + $0x158] sm:$0xff]  ;;  %v195_v16 = vld [vmem:[#allocation3 + $0xd0] sm:$0xff]  ;;  %v72_v44 = vadd.s32 8, %v1392_v35  ;;  %v79_v54 = vand.u32 15, %v1392_v35  ;;  %v74_v55 = vadd.s32 24, %v1392_v35 }
  0x24   :  { %976 = vmatpush3.msra.mxu0 %v183_v6  ;;  %1123 = vmatpush3.msra.mxu1 %v215_v5  ;;  %v181_v12 = vld [vmem:[#allocation3 + $0x60] sm:$0xff]  ;;  %v180_v15 = vld [vmem:[#allocation3 + $0x58] sm:$0xff]  ;;  %v211_v17 = vld [vmem:[#allocation3 + $0x150] sm:$0xff]  ;;  %v73_v2 = vadd.s32 16, %v1392_v35 }
  0x25   :  { %977 = vmatprep.subr.mxu0 %v198_v7  ;;  %1124 = vmatprep.subr.mxu1 %v214_v8  ;;  %v179_v18 = vld [vmem:[#allocation3 + $0x50] sm:$0xff]  ;;  %v194_v19 = vld [vmem:[#allocation3 + $0xc8] sm:$0xff]  ;;  %v193_v22 = vld [vmem:[#allocation3 + $0xc0] sm:$0xff]  ;;  %v86_v58 = vand.u32 15, %v72_v44  ;;  %vm1423_vm2 = vcmp.ne.s32.totalorder %v79_v54, 0  ;;  %v100_v3 = vand.u32 15, %v74_v55 }
  0x26   :  { %978 = vmatpush3.msra.mxu0 %v182_v9  ;;  %1125 = vmatpush3.msra.mxu1 %v214_v8  ;;  %v210_v20 = vld [vmem:[#allocation3 + $0x148] sm:$0xff]  ;;  %v209_v23 = vld [vmem:[#allocation3 + $0x140] sm:$0xff]  ;;  %v192_v25 = vld [vmem:[#allocation3 + $0xb8] sm:$0xff] }
  0x27   :  { %979 = vmatprep.subr.mxu0 %v197_v10  ;;  %1126 = vmatprep.subr.mxu1 %v213_v11  ;;  %v178_v21 = vld [vmem:[#allocation3 + $0x48] sm:$0xff]  ;;  %v177_v24 = vld [vmem:[#allocation3 + $0x40] sm:$0xff]  ;;  %v208_v26 = vld [vmem:[#allocation3 + $0x138] sm:$0xff]  ;;  %vm1430_vm3 = vcmp.ne.s32.totalorder %v86_v58, 15  ;;  %vm1445_vm4 = vcmp.ne.s32.totalorder %v100_v3, 15 }
  0x28   :  { %980 = vmatpush3.msra.mxu0 %v181_v12  ;;  %1127 = vmatpush3.msra.mxu1 %v213_v11  ;;  %v176_v27 = vld [vmem:[#allocation3 + $0x38] sm:$0xff]  ;;  %v191_v29 = vld [vmem:[#allocation3 + $0xb0] sm:$0xff]  ;;  %v190_v32 = vld [vmem:[#allocation3 + $0xa8] sm:$0xff]  ;;  %v93_v11 = vand.u32 15, %v73_v2 }
  0x29   :  { %981 = vmatprep.subr.mxu0 %v196_v13  ;;  %1128 = vmatprep.subr.mxu1 %v212_v14  ;;  %v207_v30 = vld [vmem:[#allocation3 + $0x130] sm:$0xff]  ;;  %v206_v33 = vld [vmem:[#allocation3 + $0x128] sm:$0xff]  ;;  %v189_v36 = vld [vmem:[#allocation3 + $0xa0] sm:$0xff] }
  0x2a   :  { %982 = vmatpush3.msra.mxu0 %v180_v15  ;;  %1129 = vmatpush3.msra.mxu1 %v212_v14  ;;  %v175_v31 = vld [vmem:[#allocation3 + $0x30] sm:$0xff]  ;;  %v174_v34 = vld [vmem:[#allocation3 + $0x28] sm:$0xff]  ;;  %v205_v37 = vld [vmem:[#allocation3 + $0x120] sm:$0xff]  ;;  %vm1453_vm5 = vcmp.ne.s32.totalorder %v93_v11, 0 }
  0x2b   :  { %983 = vmatprep.subr.mxu0 %v195_v16  ;;  %1130 = vmatprep.subr.mxu1 %v211_v17  ;;  %v173_v38 = vld [vmem:[#allocation3 + $0x20] sm:$0xff]  ;;  %v188_v39 = vld [vmem:[#allocation3 + $0x98] sm:$0xff]  ;;  %v187_v45 = vld [vmem:[#allocation3 + $0x90] sm:$0xff] }
  0x2c   :  { %984 = vmatpush3.msra.mxu0 %v179_v18  ;;  %1131 = vmatpush3.msra.mxu1 %v211_v17  ;;  %v204_v40 = vld [vmem:[#allocation3 + $0x118] sm:$0xff]  ;;  %v1402_v43 = vld [vmem:[%s1554_s0 + $0x8] sm:$0xff]  ;;  %v203_v46 = vld [vmem:[#allocation3 + $0x110] sm:$0xff] }
  0x2d   :  { %985 = vmatprep.subr.mxu0 %v194_v19  ;;  %1132 = vmatprep.subr.mxu1 %v210_v20  ;;  %v172_v41 = vld [vmem:[#allocation3 + $0x18] sm:$0xff]  ;;  %v1408_v47 = vld [vmem:[%s1554_s0 + $0x10] sm:$0xff]  ;;  %v150_v53 = vrot.slane %v1402_v43, 1  ;;  %v185_v60 = vld [vmem:[#allocation3 + $0x80] sm:$0xff]  ;;  %v137_v7 = vrot.slane %v1402_v43, 7 }
  0x2e   :  { %986 = vmatpush3.msra.mxu0 %v178_v21  ;;  %1133 = vmatpush3.msra.mxu1 %v210_v20  ;;  %v1397_v42 = vld [vmem:[%s1554_s0] sm:$0xff]  ;;  %v171_v48 = vld [vmem:[#allocation3 + $0x10] sm:$0xff]  ;;  %v186_v50 = vld [vmem:[#allocation3 + $0x88] sm:$0xff]  ;;  %v152_v59 = vrot.slane %v1408_v47, 1  ;;  %v139_v14 = vrot.slane %v1408_v47, 7 }
  0x2f   :  { %987 = vmatprep.subr.mxu0 %v193_v22  ;;  %1134 = vmatprep.subr.mxu1 %v209_v23  ;;  %v1413_v49 = vld [vmem:[%s1554_s0 + $0x18] sm:$0xff]  ;;  %v202_v51 = vld [vmem:[#allocation3 + $0x108] sm:$0xff]  ;;  %v149_v52 = vrot.slane %v1397_v42, 1  ;;  %v136_v57 = vrot.slane %v1397_v42, 7  ;;  %v201_v61 = vld [vmem:[#allocation3 + $0x100] sm:$0xff] }
  0x30   :  { %988 = vmatpush3.msra.mxu0 %v177_v24  ;;  %1135 = vmatpush3.msra.mxu1 %v209_v23  ;;  %v170_v56 = vld [vmem:[#allocation3 + $0x8] sm:$0xff]  ;;  %v154_v62 = vrot.slane %v1413_v49, 1  ;;  %v169_v63 = vld [vmem:[#allocation3] sm:$0xff]  ;;  %v153_v5 = vsel %vm148_vm0, %v150_v53, %v152_v59  ;;  %v480_v9 = vld [vmem:[#allocation6 + $0xf8] sm:$0xff]  ;;  %v140_v21 = vsel %vm135_vm1, %v137_v7, %v139_v14  ;;  %v141_v23 = vrot.slane %v1413_v49, 7 }
  0x31   :  { %989 = vmatprep.subr.mxu0 %v192_v25  ;;  %1136 = vmatprep.subr.mxu1 %v208_v26  ;;  %v151_v0 = vsel %vm148_vm0, %v149_v52, %v150_v53  ;;  %v147_v4 = vsel %vm135_vm1, 0.0, %v136_v57  ;;  %v496_v10 = vld [vmem:[#allocation6 + $0x178] sm:$0xff]  ;;  %v138_v13 = vsel %vm135_vm1, %v136_v57, %v137_v7  ;;  %v479_v17 = vld [vmem:[#allocation6 + $0xf0] sm:$0xff]  ;;  %v478_v20 = vld [vmem:[#allocation6 + $0xe8] sm:$0xff] }
  0x32   :  { %990 = vmatpush3.msra.mxu0 %v176_v27  ;;  %1137 = vmatpush3.msra.mxu1 %v208_v26  ;;  %v155_v8 = vsel %vm148_vm0, %v152_v59, %v154_v62  ;;  %v464_v12 = vld [vmem:[#allocation6 + $0x78] sm:$0xff]  ;;  %v160_v15 = vsel %vm148_vm0, %v154_v62, 0.0  ;;  %v463_v18 = vld [vmem:[#allocation6 + $0x70] sm:$0xff]  ;;  %v494_v24 = vld [vmem:[#allocation6 + $0x168] sm:$0xff] }
  0x33   :  { %991 = vmatprep.subr.mxu0 %v191_v29  ;;  %1138 = vmatprep.subr.mxu1 %v207_v30  ;;  %v495_v19 = vld [vmem:[#allocation6 + $0x170] sm:$0xff]  ;;  %v462_v25 = vld [vmem:[#allocation6 + $0x68] sm:$0xff]  ;;  %v477_v26 = vld [vmem:[#allocation6 + $0xe0] sm:$0xff]  ;;  %v142_v29 = vsel %vm135_vm1, %v139_v14, %v141_v23 }
  0x34   :  { %992 = vmatpush3.msra.mxu0 %v175_v31  ;;  %1139 = vmatpush3.msra.mxu1 %v207_v30  ;;  %v461_v27 = vld [vmem:[#allocation6 + $0x60] sm:$0xff]  ;;  %v476_v30 = vld [vmem:[#allocation6 + $0xd8] sm:$0xff]  ;;  %v471_v44 = vld [vmem:[#allocation6 + $0xb0] sm:$0xff] }
  0x35   :  { %993 = vmatprep.subr.mxu0 %v190_v32  ;;  %1140 = vmatprep.subr.mxu1 %v206_v33  ;;  %v493_v28 = vld [vmem:[#allocation6 + $0x160] sm:$0xff]  ;;  %v460_v31 = vld [vmem:[#allocation6 + $0x58] sm:$0xff]  ;;  %v475_v32 = vld [vmem:[#allocation6 + $0xd0] sm:$0xff] }
  0x36   :  { %994 = vmatpush3.msra.mxu0 %v174_v34  ;;  %1141 = vmatpush3.msra.mxu1 %v206_v33  ;;  %v459_v33 = vld [vmem:[#allocation6 + $0x50] sm:$0xff]  ;;  %v474_v34 = vld [vmem:[#allocation6 + $0xc8] sm:$0xff]  ;;  %v469_v52 = vld [vmem:[#allocation6 + $0xa0] sm:$0xff] }
  0x37   :  { %995 = vmatprep.subr.mxu0 %v189_v36  ;;  %1142 = vmatprep.subr.mxu1 %v205_v37  ;;  %v458_v36 = vld [vmem:[#allocation6 + $0x48] sm:$0xff]  ;;  %v489_v53 = vld [vmem:[#allocation6 + $0x140] sm:$0xff]  ;;  %v468_v55 = vld [vmem:[#allocation6 + $0x98] sm:$0xff] }
  0x38   :  { %996 = vmatpush3.msra.mxu0 %v173_v38  ;;  %1143 = vmatpush3.msra.mxu1 %v205_v37  ;;  %v473_v37 = vld [vmem:[#allocation6 + $0xc0] sm:$0xff]  ;;  %v452_v57 = vld [vmem:[#allocation6 + $0x18] sm:$0xff]  ;;  %v467_v58 = vld [vmem:[#allocation6 + $0x90] sm:$0xff] }
  0x39   :  { %997 = vmatprep.subr.mxu0 %v188_v39  ;;  %1144 = vmatprep.subr.mxu1 %v204_v40  ;;  %v457_v38 = vld [vmem:[#allocation6 + $0x40] sm:$0xff]  ;;  %v472_v39 = vld [vmem:[#allocation6 + $0xb8] sm:$0xff]  ;;  %v487_v59 = vld [vmem:[#allocation6 + $0x130] sm:$0xff] }
  0x3a   :  { %998 = vmatpush3.msra.mxu0 %v172_v41  ;;  %1145 = vmatpush3.msra.mxu1 %v204_v40  ;;  %v492_v40 = vld [vmem:[#allocation6 + $0x158] sm:$0xff]  ;;  %v453_v54 = vld [vmem:[#allocation6 + $0x20] sm:$0xff]  ;;  %v486_v62 = vld [vmem:[#allocation6 + $0x128] sm:$0xff] }
  0x3b   :  { %999 = vmatprep.subr.mxu0 %v187_v45  ;;  %1146 = vmatprep.subr.mxu1 %v203_v46  ;;  %v456_v41 = vld [vmem:[#allocation6 + $0x38] sm:$0xff]  ;;  %v491_v45 = vld [vmem:[#allocation6 + $0x150] sm:$0xff]  ;;  %v485_v2 = vld [vmem:[#allocation6 + $0x120] sm:$0xff] }
  0x3c   :  { %1000 = vmatpush3.msra.mxu0 %v171_v48  ;;  %1147 = vmatpush3.msra.mxu1 %v203_v46  ;;  %v455_v46 = vld [vmem:[#allocation6 + $0x30] sm:$0xff]  ;;  %v470_v48 = vld [vmem:[#allocation6 + $0xa8] sm:$0xff]  ;;  %v449_v3 = vld [vmem:[#allocation6] sm:$0xff] }
  0x3d   :  { %1001 = vmatprep.subr.mxu0 %v186_v50  ;;  %1148 = vmatprep.subr.mxu1 %v202_v51  ;;  %v490_v50 = vld [vmem:[#allocation6 + $0x148] sm:$0xff]  ;;  %v703_v6 = vld [vmem:[%s1560_s6 + $0x78] sm:$0xff] }
  0x3e   :  { %1002 = vmatpush3.msra.mxu0 %v170_v56  ;;  %1149 = vmatpush3.msra.mxu1 %v202_v51  ;;  %v454_v51 = vld [vmem:[#allocation6 + $0x28] sm:$0xff]  ;;  %v488_v56 = vld [vmem:[#allocation6 + $0x138] sm:$0xff] }
  0x3f   :  { %1003 = vmatprep.subr.mxu0 %v185_v60  ;;  %1150 = vmatprep.subr.mxu1 %v201_v61  ;;  %v451_v60 = vld [vmem:[#allocation6 + $0x10] sm:$0xff]  ;;  %v482_v7 = vld [vmem:[#allocation6 + $0x108] sm:$0xff] }
  0x40   :  { %1004 = vmatpush3.msra.mxu0 %v169_v63  ;;  %281 = vmatprep.mubr.f32.mxu0 %v1397_v42  ;;  %v450_v63 = vld [vmem:[#allocation6 + $0x8] sm:$0xff] }
  0x41   :  { %1151 = vmatpush3.msra.mxu1 %v201_v61  ;;  %1152 = vmatprep.mubr.f32.mxu1 %v151_v0  ;;  %v466_v61 = vld [vmem:[#allocation6 + $0x88] sm:$0xff]  ;;  %v465_v0 = vld [vmem:[#allocation6 + $0x80] sm:$0xff] }
  0x42   :  { %946 = vmatmul.mubr.msk.f32.vlgmr.msra.gmra.mxu0 %vm1423_vm2, %v147_v4  ;;  %1153 = vmatmul.mubr.msk.f32.vlgmr.msra.gmra.mxu1 %vm1430_vm3, %v153_v5  ;;  %v484_v4 = vld [vmem:[#allocation6 + $0x118] sm:$0xff]  ;;  %v483_v5 = vld [vmem:[#allocation6 + $0x110] sm:$0xff]  ;;  %v701_v16 = vld [vmem:[%s1560_s6 + $0x68] sm:$0xff] }
  0x43   :  { %286 = vmatprep.mubr.f32.mxu0 %v1402_v43  ;;  %1155 = vmatprep.mubr.f32.mxu1 %v155_v8  ;;  %v481_v8 = vld [vmem:[#allocation6 + $0x100] sm:$0xff]  ;;  %v702_v22 = vld [vmem:[%s1560_s6 + $0x70] sm:$0xff] }
  0x44   :  { %1037 = vmatprep.subr.mxu0 %v480_v9  ;;  %1158 = vmatprep.subr.mxu1 %v496_v10 }
  0x45   :  { %1038 = vmatpush3.msra.mxu0 %v464_v12  ;;  %1159 = vmatpush3.msra.mxu1 %v496_v10 }
  0x46   :  { %287 = vmatmul.mubr.f32.gmra.mxu0 %v138_v13  ;;  %1156 = vmatmul.mubr.msk.f32.gmra.mxu1 %vm1445_vm4, %v160_v15 }
  0x47   :  { %291 = vmatprep.mubr.f32.mxu0 %v1408_v47  ;;  %1039 = vmatprep.subr.mxu0 %v479_v17  ;;  %v953_v17 = vld [vmem:[%s1557_s3] ss:$0 sm:$0xff] }
  0x48   :  { %1040 = vmatpush3.msra.mxu0 %v463_v18  ;;  %1160 = vmatprep.subr.mxu1 %v495_v19 }
  0x49   :  { %1041 = vmatprep.subr.mxu0 %v478_v20  ;;  %1161 = vmatpush3.msra.mxu1 %v495_v19 }
  0x4a   :  { %948 = vmatmul.mubr.msk.f32.gmra.mxu0 %vm1453_vm5, %v140_v21  ;;  %1162 = vmatprep.subr.mxu1 %v494_v24 }
  0x4b   :  { %296 = vmatprep.mubr.f32.mxu0 %v1413_v49  ;;  %1042 = vmatpush3.msra.mxu0 %v462_v25 }
  0x4c   :  { %1043 = vmatprep.subr.mxu0 %v477_v26  ;;  %1163 = vmatpush3.msra.mxu1 %v494_v24  ;;  %v954_v24 = vld [vmem:[%s1558_s4] ss:$0 sm:$0xff] }
  0x4d   :  { %1044 = vmatpush3.msra.mxu0 %v461_v27  ;;  %1164 = vmatprep.subr.mxu1 %v493_v28 }
  0x4e   :  { %297 = vmatmul.mubr.f32.gmra.mxu0 %v142_v29  ;;  %1045 = vmatprep.subr.mxu0 %v476_v30 }
  0x4f   :  { %1046 = vmatpush3.msra.mxu0 %v460_v31  ;;  %1165 = vmatpush3.msra.mxu1 %v493_v28 }
  0x50   :  { %1047 = vmatprep.subr.mxu0 %v475_v32  ;;  %1166 = vmatprep.subr.mxu1 %v492_v40 }
  0x51   :  { %1048 = vmatpush3.msra.mxu0 %v459_v33  ;;  %1167 = vmatpush3.msra.mxu1 %v492_v40 }
  0x52   :  { %1049 = vmatprep.subr.mxu0 %v474_v34  ;;  %1168 = vmatprep.subr.mxu1 %v491_v45 }
  0x53   :  { %1050 = vmatpush3.msra.mxu0 %v458_v36  ;;  %1169 = vmatpush3.msra.mxu1 %v491_v45 }
  0x54   :  { %1051 = vmatprep.subr.mxu0 %v473_v37  ;;  %1170 = vmatprep.subr.mxu1 %v490_v50 }
  0x55   :  { %1052 = vmatpush3.msra.mxu0 %v457_v38  ;;  %1171 = vmatpush3.msra.mxu1 %v490_v50 }
  0x56   :  { %1053 = vmatprep.subr.mxu0 %v472_v39  ;;  %1172 = vmatprep.subr.mxu1 %v489_v53 }
  0x57   :  { %1054 = vmatpush3.msra.mxu0 %v456_v41  ;;  %1173 = vmatpush3.msra.mxu1 %v489_v53 }
  0x58   :  { %1055 = vmatprep.subr.mxu0 %v471_v44  ;;  %1174 = vmatprep.subr.mxu1 %v488_v56 }
  0x59   :  { %1056 = vmatpush3.msra.mxu0 %v455_v46  ;;  %1175 = vmatpush3.msra.mxu1 %v488_v56 }
  0x5a   :  { %1057 = vmatprep.subr.mxu0 %v470_v48  ;;  %1176 = vmatprep.subr.mxu1 %v487_v59 }
  0x5b   :  { %1058 = vmatpush3.msra.mxu0 %v454_v51  ;;  %1177 = vmatpush3.msra.mxu1 %v487_v59 }
  0x5c   :  { %1059 = vmatprep.subr.mxu0 %v469_v52  ;;  %1178 = vmatprep.subr.mxu1 %v486_v62 }
  0x5d   :  { %1060 = vmatpush3.msra.mxu0 %v453_v54  ;;  %1179 = vmatpush3.msra.mxu1 %v486_v62 }
  0x5e   :  { %1061 = vmatprep.subr.mxu0 %v468_v55  ;;  %1180 = vmatprep.subr.mxu1 %v485_v2 }
  0x5f   :  { %1062 = vmatpush3.msra.mxu0 %v452_v57  ;;  %1181 = vmatpush3.msra.mxu1 %v485_v2  ;;  %v1318_v2 = vmov 0.0  }
  0x60   :  { %1063 = vmatprep.subr.mxu0 %v467_v58  ;;  %1182 = vmatprep.subr.mxu1 %v484_v4 }
  0x61   :  { %1064 = vmatpush3.msra.mxu0 %v451_v60  ;;  %1183 = vmatpush3.msra.mxu1 %v484_v4  ;;  %v699_v4 = vld [vmem:[%s1560_s6 + $0x58] sm:$0xff] }
  0x62   :  { %1065 = vmatprep.subr.mxu0 %v466_v61  ;;  %1184 = vmatprep.subr.mxu1 %v483_v5 }
  0x63   :  { %1066 = vmatpush3.msra.mxu0 %v450_v63  ;;  %1185 = vmatpush3.msra.mxu1 %v483_v5  ;;  %v698_v5 = vld [vmem:[%s1560_s6 + $0x50] sm:$0xff] }
  0x64   :  { %1067 = vmatprep.subr.mxu0 %v465_v0  ;;  %1186 = vmatprep.subr.mxu1 %v482_v7 }
  0x65   :  { %1068 = vmatpush3.msra.mxu0 %v449_v3  ;;  %1187 = vmatpush3.msra.mxu1 %v482_v7  ;;  %v700_v3 = vld [vmem:[%s1560_s6 + $0x60] sm:$0xff]  ;;  %v697_v7 = vld [vmem:[%s1560_s6 + $0x48] sm:$0xff] }
  0x66   :  { %1188 = vmatprep.subr.mxu1 %v481_v8  ;;  %1196 = vmatprep.subr.mxu0 %v1318_v2 }
  0x67   :  { %1189 = vmatpush3.msra.mxu1 %v481_v8  ;;  %v696_v8 = vld [vmem:[%s1560_s6 + $0x40] sm:$0xff] }
  0x68   :  { %1231 = vmatprep.subr.mxu1 %v1318_v2 }
 0x102   :  { %v1005_v9 = vpop.f32.mrf.mxu0  ;;  %v1154_v10 = vpop.f32.mrf.mxu1 }
 0x104   :  { %v1006_v11 = vpop.f32.mrf.mxu0  ;;  %v368_v13 = vpop.f32.mrf.mxu1 }
 0x105   :  { %v1007_v12 = vadd.f32 %v1006_v11, %v1005_v9  ;;  %v695_v9 = vld [vmem:[%s1560_s6 + $0x38] sm:$0xff]  ;;  %v693_v11 = vld [vmem:[%s1560_s6 + $0x28] sm:$0xff] }
 0x106   :  { %v1008_v14 = vpop.f32.mrf.mxu0  ;;  %v1157_v23 = vpop.f32.mrf.mxu1 }
 0x107   :  { %v369_v15 = vadd.f32 %v1007_v12, %v368_v13  ;;  %v692_v12 = vld [vmem:[%s1560_s6 + $0x20] sm:$0xff]  ;;  %v691_v13 = vld [vmem:[%s1560_s6 + $0x18] sm:$0xff] }
 0x108   :  { %v1009_v18 = vpop.f32.mrf.mxu0  ;;  %v378_v31 = vpop.f32.mrf.mxu1 }
 0x109   :  { %v387_v19 = vmax.f32 %v369_v15, 0.0  ;;  %v1010_v20 = vadd.f32 %v1009_v18, %v1008_v14  ;;  %v690_v14 = vld [vmem:[%s1560_s6 + $0x10] sm:$0xff]  ;;  %v689_v15 = vld [vmem:[%s1560_s6 + $0x8] sm:$0xff]  ;;  %v787_v18 = vld [vmem:[%s1562_s8] sm:$0x1]  ;;  %s1321_s8 = smov [#allocation8]  }
 0x10a   :  { %v1011_v21 = vpop.f32.mrf.mxu0 }
 0x10b   :  { %v398_v25 = vmul.f32 %v953_v17, %v387_v19  ;;  %v374_v26 = vadd.f32 %v1154_v10, %v1010_v20  ;;  %v694_v10 = vld [vmem:[%s1560_s6 + $0x30] sm:$0xff] }
 0x10c   :  { %v1012_v27 = vpop.f32.mrf.mxu0 }
 0x10d   :  { %v388_v28 = vmax.f32 %v374_v26, 0.0  ;;  %v1013_v29 = vadd.f32 %v1012_v27, %v1011_v21  ;;  %v409_v30 = vadd.f32 %v954_v24, %v398_v25  ;;  %v955_v25 = vld [vmem:[%s1559_s5] ss:$0 sm:$0xff] }
 0x10e   :  { %v1014_v32 = vpop.f32.mrf.mxu0 }
 0x10f   :  { %v399_v33 = vmul.f32 %v953_v17, %v388_v28  ;;  %v379_v34 = vadd.f32 %v1013_v29, %v378_v31  ;;  %v417_v36 = vrot.slane %v409_v30, 7  ;;  %568 = vmatprep.mubr.f32.mxu0 %v409_v30  ;;  %v429_v44 = vrot.slane %v409_v30, 1 }
 0x110   :  { %v1015_v37 = vpop.f32.mrf.mxu0 }
 0x111   :  { %v389_v38 = vmax.f32 %v379_v34, 0.0  ;;  %v1016_v39 = vadd.f32 %v1015_v37, %v1014_v32  ;;  %v428_v40 = vsel %vm135_vm1, 0.0, %v417_v36  ;;  %v410_v41 = vadd.f32 %v954_v24, %v399_v33 }
 0x112   :  { %957 = vmatmul.mubr.msk.f32.vlgmr.msra.gmra.mxu0 %vm1423_vm2, %v428_v40 }
 0x113   :  { %v400_v45 = vmul.f32 %v953_v17, %v389_v38  ;;  %v384_v46 = vadd.f32 %v1157_v23, %v1016_v39  ;;  %573 = vmatprep.mubr.f32.mxu0 %v410_v41  ;;  %v418_v48 = vrot.slane %v410_v41, 7  ;;  %v430_v50 = vrot.slane %v410_v41, 1  ;;  %1197 = vmatpush3.msra.mxu0 %v703_v6 }
 0x114   :  { %1198 = vmatprep.subr.mxu0 %v1318_v2 }
 0x115   :  { %v390_v51 = vmax.f32 %v384_v46, 0.0  ;;  %v419_v52 = vsel %vm135_vm1, %v417_v36, %v418_v48  ;;  %v431_v53 = vsel %vm148_vm0, %v429_v44, %v430_v50  ;;  %v411_v54 = vadd.f32 %v954_v24, %v400_v45  ;;  %1199 = vmatpush3.msra.mxu0 %v702_v22 }
 0x116   :  { %574 = vmatmul.mubr.f32.gmra.mxu0 %v419_v52  ;;  %1190 = vmatprep.mubr.f32.mxu1 %v431_v53 }
 0x117   :  { %v401_v55 = vmul.f32 %v953_v17, %v390_v51  ;;  %v432_v56 = vrot.slane %v411_v54, 1  ;;  %578 = vmatprep.mubr.f32.mxu0 %v411_v54  ;;  %v420_v57 = vrot.slane %v411_v54, 7  ;;  %1200 = vmatprep.subr.mxu0 %v1318_v2  ;;  %v688_v17 = vld [vmem:[%s1560_s6] sm:$0xff] }
 0x118   :  { %1201 = vmatpush3.msra.mxu0 %v701_v16 }
 0x119   :  { %v421_v1 = vsel %vm135_vm1, %v418_v48, %v420_v57  ;;  %v433_v58 = vsel %vm148_vm0, %v430_v50, %v432_v56  ;;  %v412_v59 = vadd.f32 %v954_v24, %v401_v55  ;;  %1202 = vmatprep.subr.mxu0 %v1318_v2 }
 0x11a   :  { %959 = vmatmul.mubr.msk.f32.gmra.mxu0 %vm1453_vm5, %v421_v1  ;;  %1191 = vmatmul.mubr.msk.f32.vlgmr.msra.gmra.mxu1 %vm1430_vm3, %v433_v58 }
 0x11b   :  { %583 = vmatprep.mubr.f32.mxu0 %v412_v59  ;;  %v422_v60 = vrot.slane %v412_v59, 7  ;;  %v434_v61 = vrot.slane %v412_v59, 1  ;;  %1203 = vmatpush3.msra.mxu0 %v700_v3  ;;  %v965_v3 = vld [vmem:[%s1563_s9] ss:$0 sm:$0xff]  ;;  %s932_s9 = sshll.u32 %s1321_s8, 4  ;;  %s933_s9 = int_to_ptr.vmem [resolvable:$true] %s932_s9 }
 0x11c   :  { %1204 = vmatprep.subr.mxu0 %v1318_v2  ;;  %1232 = vmatpush3.msk.msra.mxu1 %vm135_vm1, %v787_v18  ;;  %v903_v18 = vsub.s32 0, %v1392_v35  ;;  %s1288_s1 = scalar_lea.vmem %s933_s9, 512  ;;  %p1293_p11 = scmp.lt.s32.totalorder %s933_s9, %s933_s9 }
 0x11d   :  { %v423_v62 = vsel %vm135_vm1, %v420_v57, %v422_v60  ;;  %v435_v63 = vsel %vm148_vm0, %v432_v56, %v434_v61  ;;  %v440_v0 = vsel %vm148_vm0, %v434_v61, 0.0  ;;  %1205 = vmatpush3.msra.mxu0 %v699_v4  ;;  %p1289_p10 = scmp.ne.s32.totalorder %s933_s9, %s1288_s1  ;;  %p1294_p12 = scmp.lt.s32.totalorder %s1288_s1, %s1288_s1 }
 0x11e   :  { %584 = vmatmul.mubr.f32.gmra.mxu0 %v423_v62  ;;  %1193 = vmatprep.mubr.f32.mxu1 %v435_v63 }
 0x11f   :  { %1194 = vmatmul.mubr.msk.f32.gmra.mxu1 %vm1445_vm4, %v440_v0  ;;  %1206 = vmatprep.subr.mxu0 %v1318_v2  ;;  %v964_v0 = vld [vmem:[#allocation2] ss:$0 sm:$0xff]  ;;  %p1295_p13 = por %p1294_p12, %p1293_p11 }
 0x120   :  { %1207 = vmatpush3.msra.mxu0 %v698_v5  ;;  %1228 = vmatprep.mubr.msk.f32.mxu0 %vm1319_vm6, %v1318_v2 }
 0x121   :  { %1208 = vmatprep.subr.mxu0 %v1318_v2  ;;  %1233 = vmatprep.mubr.msk.f32.mxu1 %vm1319_vm6, %v1318_v2  ;;  %p1296_p0 = pnand %p1295_p13, %p1289_p10 }
 0x122   :  { %1209 = vmatpush3.msra.mxu0 %v697_v7 }
 0x123   :  { %1210 = vmatprep.subr.mxu0 %v1318_v2 }
 0x124   :  { %1211 = vmatpush3.msra.mxu0 %v696_v8 }
 0x125   :  { %1212 = vmatprep.subr.mxu0 %v1318_v2 }
 0x126   :  { %1213 = vmatpush3.msra.mxu0 %v695_v9 }
 0x127   :  { %1214 = vmatprep.subr.mxu0 %v1318_v2 }
 0x128   :  { %1215 = vmatpush3.msra.mxu0 %v694_v10 }
 0x129   :  { %1216 = vmatprep.subr.mxu0 %v1318_v2 }
 0x12a   :  { %1217 = vmatpush3.msra.mxu0 %v693_v11  ;;  %v1320_v11 = vmov 1966171168  }
 0x12b   :  { %1218 = vmatprep.subr.mxu0 %v1318_v2 }
 0x12c   :  { %1219 = vmatpush3.msra.mxu0 %v692_v12  ;;  %v880_v12 = vunpack.c.l.s4 %v1320_v11 }
 0x12d   :  { %1220 = vmatprep.subr.mxu0 %v1318_v2 }
 0x12e   :  { %1221 = vmatpush3.msra.mxu0 %v691_v13  ;;  %v881_v13 = vunpack.c.0.s8 %v880_v12 }
 0x12f   :  { %1222 = vmatprep.subr.mxu0 %v1318_v2 }
 0x130   :  { %1223 = vmatpush3.msra.mxu0 %v690_v14  ;;  %v884_v14 = vsub.s32 %v881_v13, %v1392_v35 }
 0x131   :  { %1224 = vmatprep.subr.mxu0 %v1318_v2 }
 0x132   :  { %1225 = vmatpush3.msra.mxu0 %v689_v15 }
 0x133   :  { %1226 = vmatprep.subr.mxu0 %v1318_v2 }
 0x134   :  { %1227 = vmatpush3.msra.mxu0 %v688_v17 }
 0x1d2   :  { %v1069_v19 = vpop.f32.mrf.mxu0 }
 0x1d4   :  { %v1070_v20 = vpop.f32.mrf.mxu0 }
 0x1d5   :  { %v1071_v23 = vadd.f32 %v1070_v20, %v1069_v19 }
 0x1d6   :  { %v1072_v21 = vpop.f32.mrf.mxu0 }
 0x1d7   :  { %v571_v30 = vadd.f32 %v1071_v23, %v955_v25 }
 0x1d8   :  { %v1073_v24 = vpop.f32.mrf.mxu0 }
 0x1d9   :  { %v1074_v26 = vadd.f32 %v1073_v24, %v1072_v21 }
 0x1da   :  { %v1075_v27 = vpop.f32.mrf.mxu0  ;;  %v1192_v28 = vpop.f32.mrf.mxu1 }
 0x1db   :  { %v576_v29 = vadd.f32 %v1074_v26, %v955_v25 }
 0x1dc   :  { %v1076_v31 = vpop.f32.mrf.mxu0  ;;  %v655_v32 = vpop.f32.mrf.mxu1 }
 0x1dd   :  { %v661_v33 = vadd.f32 %v1192_v28, %v576_v29  ;;  %v1077_v34 = vadd.f32 %v1076_v31, %v1075_v27  ;;  %v656_v36 = vadd.f32 %v655_v32, %v571_v30 }
 0x1de   :  { %v1078_v37 = vpop.f32.mrf.mxu0 }
 0x1df   :  { %v674_v38 = vadd.f32 %v661_v33, %v656_v36  ;;  %v1195_v39 = vpop.f32.mrf.mxu1  ;;  %v581_v45 = vadd.f32 %v1077_v34, %v955_v25 }
 0x1e0   :  { %v1079_v40 = vpop.f32.mrf.mxu0 }
 0x1e1   :  { %v675_v41 = vrot.slane %v674_v38, 4  ;;  %v1080_v44 = vadd.f32 %v1079_v40, %v1078_v37  ;;  %v665_v46 = vpop.f32.mrf.mxu1 }
 0x1e2   :  { %v666_v51 = vadd.f32 %v665_v46, %v581_v45 }
 0x1e3   :  { %v676_v48 = vadd.f32 %v675_v41, %v674_v38  ;;  %v586_v50 = vadd.f32 %v1080_v44, %v955_v25 }
 0x1e5   :  { %v671_v52 = vadd.f32 %v1195_v39, %v586_v50  ;;  %v677_v53 = vrot.slane %v676_v48, 2 }
 0x1e7   :  { %v681_v54 = vadd.f32 %v671_v52, %v666_v51  ;;  %v678_v56 = vadd.f32 %v677_v53, %v676_v48 }
 0x1e9   :  { %v682_v55 = vrot.slane %v681_v54, 4  ;;  %v679_v58 = vrot.slane %v678_v56, 1 }
 0x1eb   :  { %v683_v57 = vadd.f32 %v682_v55, %v681_v54  ;;  %v680_v61 = vadd.f32 %v679_v58, %v678_v56 }
 0x1ed   :  { %v684_v1 = vrot.slane %v683_v57, 2 }
 0x1ef   :  { %v685_v59 = vadd.f32 %v684_v1, %v683_v57 }
 0x1f1   :  { %v686_v60 = vrot.slane %v685_v59, 1 }
 0x1f3   :  { %v687_v62 = vadd.f32 %v686_v60, %v685_v59 }
 0x1f5   :  { %v714_v63 = vsel %vm713_vm7, %v687_v62, %v680_v61 }
 0x1f6   :  { %1229 = vmatmul.mubr.f32.vlgmr.msra.gmra.mxu0 %v714_v63 }
 0x2b6   :  { %v782_v2 = vpop.f32.mrf.mxu0 }
 0x2b7   :  { %v783_v6 = vadd.f32 %v964_v0, %v782_v2 }
 0x2b8   :  { %v1230_v22 = vpop.f32.mrf.mxu0 }
 0x2b9   :  { %v786_v16 = vmax.f32 %v783_v6, 0.0 }
 0x2bb   :  { %1234 = vmatmul.mubr.msk.f32.vlgmr.msra.gmra.mxu1 %vm795_vm8, %v786_v16 }
 0x37b   :  { %v868_v4 = vpop.f32.mrf.mxu1 }
 0x37c   :  { %v869_v5 = vadd.f32 %v965_v3, %v868_v4 }
 0x37d   :  { %v1235_v7 = vpop.f32.mrf.mxu1 }
 0x37e   :  { %v968_v8 = vmul.f32 -1.442695, %v869_v5 }
 0x380   :  { %1244 = vpow2.f32 %v968_v8 }
 0x38d   :  { %v1245_v9 = vpop.eup %1244 }
 0x38e   :  { %v875_v10 = vadd.f32 1.0, %v1245_v9 }
 0x390   :  { %1246 = vrcp.f32 %v875_v10 }
 0x39d   :  { %v1247_v15 = vpop.eup %1246 }
 0x39e   :  { %v885_v17 = vrot.slane %v1247_v15, %v884_v14 }
 0x3a0   :  { %v886_v19 = vcombine.high %v885_v17, %v885_v17  ;;  %v893_v20 = vrot.slane %v885_v17, %v884_v14 }
 0x3a2   :  { %v900_v21 = vrot.slane %v886_v19, %v884_v14  ;;  %v904_v23 = vrot.slane %v893_v20, %v903_v18 }
 0x3a4   :  { %v908_v24 = vrot.slane %v900_v21, %v903_v18  ;;  %v911_v25 = vmul.f32 %v904_v23, %v656_v36  ;;  %v912_v26 = vmul.f32 %v904_v23, %v661_v33 }
 0x3a6   :  { %v913_v27 = vmul.f32 %v908_v24, %v666_v51  ;;  %v914_v28 = vmul.f32 %v908_v24, %v671_v52  ;;  %v915_v29 = vadd.f32 %v911_v25, %v1397_v42  ;;  %v916_v30 = vadd.f32 %v912_v26, %v1402_v43 }
 0x3a8   :  { %v917_v31 = vadd.f32 %v913_v27, %v1408_v47  ;;  %v918_v32 = vadd.f32 %v914_v28, %v1413_v49  ;;  %v919_v35 = vmax.f32 %v915_v29, 0.0  ;;  %v920_v34 = vmax.f32 %v916_v30, 0.0 }
 0x3aa   :  { %v921_v37 = vmax.f32 %v917_v31, 0.0  ;;  %v922_v38 = vmax.f32 %v918_v32, 0.0  ;;  %923 = vst [vmem:[#allocation8] sm:$0xff] %v919_v35  ;;  %924 = vst [vmem:[#allocation8 + $0x8] sm:$0xff] %v920_v34 }
 0x3ac   :  { %925 = vst [vmem:[#allocation8 + $0x10] sm:$0xff] %v921_v37  ;;  %926 = vst [vmem:[#allocation8 + $0x18] sm:$0xff] %v922_v38 }
 0x3ad   :  { %1299 = shalt.err (!%p1296_p0)
}
 0x3ae   :  { %938 = dma.vmem_to_hbm [thread:$0]  %s933_s9, 512, %s1564_s10, [#allocation5], %s1315_s18, %s1315_s18, %s1316_s19  }
 0x3af   :  { %1312 = dma.done.wait [#allocation5], 512  }
 0x3b0   :  { %1313 = vsyncadd [#allocation5], 4294966784 }
 0x3b1   :  { %942 = vsyncpa [#allocation4], 1 }
 0x3b2   :  { %943 = vsyncpa [#allocation7], 1 }
 0x3b3   :  { %944 = vsyncpa [#allocation5], 1 }

</bundles_post_ra>
